<compile_context>
chip_gen: v6e
topology: v6e:2x2x1
jax: 0.10.0
libtpu: 0.0.40
codegen_flags: <defaults>
</compile_context>

<pallas_src>
import jax
import jax.numpy as jnp
from jax.experimental import pallas as pl
from jax.experimental.pallas import tpu as pltpu

IN_FEATURES = 28 * 28     # 784
NUM_CLASSES = 10
LANE = 128
_MIB = 1 << 20


def _round_up(x, m):
    return (x + m - 1) // m * m


def _tile_b_max():
    """Generation-aware max batch-tile rows. Safe fallback: 2048."""
    try:
        kind = jax.devices()[0].device_kind.lower()
    except Exception:
        return 2048
    if "v5e" in kind or "v5 lite" in kind or "v5lite" in kind:
        # ~0.82 TB/s HBM: a 1024-row f32 step is ~3.7 us, step overhead <10%.
        return 1024
    if "v7" in kind or "tpu7" in kind:
        # ~3.2 TB/s HBM: 4096-row tiles keep per-step overhead <10%.
        return 4096
    # v6e and unknown chips: ~93-96% of roofline, fits VMEM comfortably.
    return 2048


def linear_kernel(x_ref, w_ref, b_ref, o_ref):
    # Hot path: MXU matmul with f32 accumulation + f32 bias add, all in VMEM.
    acc = jnp.dot(x_ref[...], w_ref[...], preferred_element_type=jnp.float32)
    o_ref[...] = (acc + b_ref[...]).astype(o_ref.dtype)


def single_neuron_forward(x, w, b):
    """x: [B, *] (flattened to [B, 784]), w: [784, 10], b: [10] -> [B, 10].

    Dtype of x/w is streamed as supplied (f32 or bf16); accumulation is f32.
    """
    batch = x.shape[0]
    x2d = x.reshape(batch, -1)                     # x.view(x.size(0), -1)
    assert x2d.shape[1] == IN_FEATURES, x2d.shape
    b2d = b.reshape(1, NUM_CLASSES).astype(jnp.float32)

    out_dtype = x2d.dtype
    in_itemsize = jnp.dtype(x2d.dtype).itemsize
    w_itemsize = jnp.dtype(w.dtype).itemsize
    out_itemsize = jnp.dtype(out_dtype).itemsize

    # Sublane-packing row alignment: 8 rows (f32), 16 (bf16), 32 (int8).
    row_align = max(8, 32 // in_itemsize)

    tile_max = _tile_b_max()
    if batch > tile_max:
        # Stream fixed tiles; pl.cdiv masks the partial tail block.
        tile_b = tile_max
    elif batch >= 1024:
        # Mid-size batch: force a >=2-step grid so both v7x TensorCores get
        # work via the "parallel" axis; essentially free on 1-TC chips.
        tile_b = _round_up(pl.cdiv(batch, 2), row_align)
    else:
        # Block equals the full array dim -> always a legal block shape.
        tile_b = batch
    grid = (pl.cdiv(batch, tile_b),)

    # VMEM budget uses PADDED tile sizes: 784 lanes -> 896, 10 lanes -> 128.
    lanes_in = _round_up(IN_FEATURES, LANE)        # 896
    lanes_out = _round_up(NUM_CLASSES, LANE)       # 128
    x_tile_bytes = tile_b * lanes_in * in_itemsize
    o_tile_bytes = tile_b * lanes_out * out_itemsize
    w_tile_bytes = IN_FEATURES * lanes_out * w_itemsize
    b_tile_bytes = 8 * LANE * 4
    # Conservatively assume double-buffering on every operand, then headroom.
    vmem_budget = 2 * (x_tile_bytes + o_tile_bytes + w_tile_bytes) + b_tile_bytes
    vmem_limit = min(max(int(vmem_budget * 1.25) + 4 * _MIB, 32 * _MIB), 56 * _MIB)

    # CostEstimate tracks the actual streamed dtypes (bf16 path included).
    cost = pl.CostEstimate(
        flops=2 * batch * IN_FEATURES * NUM_CLASSES,
        bytes_accessed=(batch * IN_FEATURES * in_itemsize
                        + IN_FEATURES * NUM_CLASSES * w_itemsize
                        + NUM_CLASSES * 4
                        + batch * NUM_CLASSES * out_itemsize),
        transcendentals=0,
    )

    return pl.pallas_call(
        linear_kernel,
        out_shape=jax.ShapeDtypeStruct((batch, NUM_CLASSES), out_dtype),
        grid_spec=pltpu.PrefetchScalarGridSpec(
            num_scalar_prefetch=0,
            grid=grid,
            in_specs=[
                # x streams by batch tile.
                pl.BlockSpec((tile_b, IN_FEATURES), lambda i: (i, 0)),
                # Weight and bias stay VMEM-resident across all iterations.
                pl.BlockSpec((IN_FEATURES, NUM_CLASSES), lambda i: (0, 0)),
                pl.BlockSpec((1, NUM_CLASSES), lambda i: (0, 0)),
            ],
            # Output kept at 10 lanes: writeback is ~1.3% of HBM traffic and
            # should stay hidden under the x-stream; only pad N to 128 (or emit
            # a transposed (10, B) slab) if an xprof trace shows the masked
            # strided writeback actually exposed.
            out_specs=pl.BlockSpec((tile_b, NUM_CLASSES), lambda i: (i, 0)),
        ),
        compiler_params=pltpu.CompilerParams(
            dimension_semantics=("parallel",),   # independent batch tiles
            vmem_limit_bytes=vmem_limit,
        ),
        cost_estimate=cost,
    )(x2d, w, b2d)


if __name__ == "__main__":
    key = jax.random.PRNGKey(0)
    k_x, k_w, k_b = jax.random.split(key, 3)

    # Deterministic parameter init (PyTorch Linear default: U(-1/sqrt(in), 1/sqrt(in))).
    bound = 1.0 / jnp.sqrt(jnp.float32(IN_FEATURES))
    w = jax.random.uniform(k_w, (IN_FEATURES, NUM_CLASSES),
                           minval=-bound, maxval=bound, dtype=jnp.float32)
    b = jax.random.uniform(k_b, (NUM_CLASSES,),
                           minval=-bound, maxval=bound, dtype=jnp.float32)

    # Small example input: batch=8 "images" of shape 1x28x28 (NCHW), flattened
    # inside the forward just like the PyTorch module's x.view(x.size(0), -1).
    batch = 8
    x = jax.random.normal(k_x, (batch, 1, 28, 28), dtype=jnp.float32)
    logits = single_neuron_forward(x, w, b)
    jax.block_until_ready(logits)
    ref = x.reshape(batch, -1) @ w + b
    assert logits.shape == (batch, NUM_CLASSES)
    assert jnp.allclose(logits, ref, atol=1e-5, rtol=1e-5)

    # Multi-step grid path (megacore split / streamed tiles + partial tail).
    batch2 = 2080
    x2 = jax.random.normal(k_x, (batch2, 1, 28, 28), dtype=jnp.float32)
    logits2 = single_neuron_forward(x2, w, b)
    jax.block_until_ready(logits2)
    ref2 = x2.reshape(batch2, -1) @ w + b
    assert logits2.shape == (batch2, NUM_CLASSES)
    assert jnp.allclose(logits2, ref2, atol=1e-4, rtol=1e-4)

    # Optional bf16 streaming path: caller supplies bf16 x/w at the boundary
    # (halves the dominant HBM read); accumulation stays f32 inside the kernel.
    xb = x2.astype(jnp.bfloat16)
    wb = w.astype(jnp.bfloat16)
    logits3 = single_neuron_forward(xb, wb, b)
    jax.block_until_ready(logits3)
    ref3 = (xb.reshape(batch2, -1).astype(jnp.float32)
            @ wb.astype(jnp.float32) + b)
    assert logits3.shape == (batch2, NUM_CLASSES)
    assert jnp.allclose(logits3.astype(jnp.float32), ref3, atol=5e-2, rtol=5e-2)

    print("KERNEL_OK")
</pallas_src>

<mosaic_0001>
module attributes {stable_mosaic.version = 11 : i64} {
  func.func @linear_kernel(%arg0: i32, %arg1: memref<8x784xf32, #tpu.memory_space<vmem>>, %arg2: memref<784x10xf32, #tpu.memory_space<vmem>>, %arg3: memref<1x10xf32, #tpu.memory_space<vmem>>, %arg4: memref<8x10xf32, #tpu.memory_space<vmem>>) attributes {dimension_semantics = [#tpu.dimension_semantics<parallel>], iteration_bounds = array<i64: 1>, scalar_prefetch = 0 : i64, scratch_operands = 0 : i64, tpu.core_type = #tpu.core_type<tc>, window_params = [{transform_indices = @transform_0, window_bounds = array<i64: 8, 784>}, {pipeline_mode = #tpu.pipeline_mode<synchronous>, transform_indices = @transform_1, window_bounds = array<i64: 784, 10>}, {pipeline_mode = #tpu.pipeline_mode<synchronous>, transform_indices = @transform_2, window_bounds = array<i64: 1, 10>}, {transform_indices = @transform_3, window_bounds = array<i64: 8, 10>}]} {
    %c0 = arith.constant 0 : index
    %c0_0 = arith.constant 0 : index
    %0 = vector.load %arg1[%c0, %c0_0] : memref<8x784xf32, #tpu.memory_space<vmem>>, vector<8x784xf32>
    %c0_1 = arith.constant 0 : index
    %c0_2 = arith.constant 0 : index
    %1 = vector.load %arg2[%c0_1, %c0_2] : memref<784x10xf32, #tpu.memory_space<vmem>>, vector<784x10xf32>
    %cst = arith.constant dense<0.000000e+00> : vector<8x10xf32>
    %2 = tpu.matmul %0, %1, %cst {dimension_numbers = #tpu.dot_dimension_numbers<[1], [0], [0], [1], [0, 0, 1, 1], [], []>} : vector<8x784xf32>, vector<784x10xf32>, vector<8x10xf32> -> vector<8x10xf32>
    %c0_3 = arith.constant 0 : index
    %c0_4 = arith.constant 0 : index
    %3 = vector.load %arg3[%c0_3, %c0_4] : memref<1x10xf32, #tpu.memory_space<vmem>>, vector<1x10xf32>
    %4 = vector.broadcast %3 : vector<1x10xf32> to vector<8x10xf32>
    %5 = arith.addf %2, %4 : vector<8x10xf32>
    %c0_5 = arith.constant 0 : index
    %c0_6 = arith.constant 0 : index
    %6 = vector.load %arg4[%c0_5, %c0_6] : memref<8x10xf32, #tpu.memory_space<vmem>>, vector<8x10xf32>
    tpu.vector_store %arg4[%c0_5, %c0_6], %5 {strides = array<i32>} : memref<8x10xf32, #tpu.memory_space<vmem>>, vector<8x10xf32>,
    return
  }
  func.func @transform_0(%arg0: i32) -> (i32, i32) {
    %c0_i32 = arith.constant 0 : i32
    %c0_i32_0 = arith.constant 0 : i32
    return %arg0, %c0_i32 : i32, i32
  }
  func.func @transform_1(%arg0: i32) -> (i32, i32) {
    %c0_i32 = arith.constant 0 : i32
    %c0_i32_0 = arith.constant 0 : i32
    %c0_i32_1 = arith.constant 0 : i32
    return %c0_i32, %c0_i32_0 : i32, i32
  }
  func.func @transform_2(%arg0: i32) -> (i32, i32) {
    %c0_i32 = arith.constant 0 : i32
    %c0_i32_0 = arith.constant 0 : i32
    %c0_i32_1 = arith.constant 0 : i32
    return %c0_i32, %c0_i32_0 : i32, i32
  }
  func.func @transform_3(%arg0: i32) -> (i32, i32) {
    %c0_i32 = arith.constant 0 : i32
    %c0_i32_0 = arith.constant 0 : i32
    return %arg0, %c0_i32 : i32, i32
  }
}

</mosaic_0001>

<bundles_post_ra>
// kernel: tpu_custom_call.1
= control target key start
LH: loop header
LB: loop body
LE: loop exit
PB: predicated region body
PF: predicated region fallthrough
CT: control target
= control target key end

     0   :  { %s913_s0 = inlined_call_operand.vmem [shape: f32[8,784], index: 0, kind: input, shape index: {}]   ;;  %s914_s1 = inlined_call_operand.vmem [shape: f32[784,10], index: 1, kind: input, shape index: {}]   ;;  %s915_s2 = inlined_call_operand.vmem [shape: f32[1,10], index: 2, kind: input, shape index: {}]   ;;  %s916_s3 = inlined_call_operand.hbm [shape: f32[8,10], index: 3, kind: output, shape index: {}]  }
   0x1   :  { %v53_v0 = vld [vmem:[%s914_s1 + $0xf8] sm:$0xff]  ;;  %v52_v2 = vld [vmem:[%s914_s1 + $0xf0] sm:$0xff]  ;;  %v51_v6 = vld [vmem:[%s914_s1 + $0xe8] sm:$0xff] }
   0x2   :  { %v37_v1 = vld [vmem:[%s914_s1 + $0x78] sm:$0xff]  ;;  %429 = vmatprep.subr.mxu0 %v53_v0  ;;  %v36_v4 = vld [vmem:[%s914_s1 + $0x70] sm:$0xff]  ;;  %v35_v8 = vld [vmem:[%s914_s1 + $0x68] sm:$0xff] }
   0x3   :  { %v85_v3 = vld [vmem:[%s914_s1 + $0x1f8] sm:$0xff]  ;;  %430 = vmatpush3.msra.mxu0 %v37_v1  ;;  %v84_v7 = vld [vmem:[%s914_s1 + $0x1f0] sm:$0xff]  ;;  %v83_v10 = vld [vmem:[%s914_s1 + $0x1e8] sm:$0xff] }
   0x4   :  { %v69_v5 = vld [vmem:[%s914_s1 + $0x178] sm:$0xff]  ;;  %464 = vmatprep.subr.mxu1 %v85_v3  ;;  %431 = vmatprep.subr.mxu0 %v52_v2  ;;  %v68_v9 = vld [vmem:[%s914_s1 + $0x170] sm:$0xff]  ;;  %v50_v11 = vld [vmem:[%s914_s1 + $0xe0] sm:$0xff] }
   0x5   :  { %465 = vmatpush3.msra.mxu1 %v69_v5  ;;  %432 = vmatpush3.msra.mxu0 %v36_v4  ;;  %v67_v12 = vld [vmem:[%s914_s1 + $0x168] sm:$0xff]  ;;  %v34_v13 = vld [vmem:[%s914_s1 + $0x60] sm:$0xff]  ;;  %v49_v15 = vld [vmem:[%s914_s1 + $0xd8] sm:$0xff] }
   0x6   :  { %466 = vmatprep.subr.mxu1 %v84_v7  ;;  %433 = vmatprep.subr.mxu0 %v51_v6  ;;  %v82_v14 = vld [vmem:[%s914_s1 + $0x1e0] sm:$0xff]  ;;  %v33_v17 = vld [vmem:[%s914_s1 + $0x58] sm:$0xff]  ;;  %v48_v19 = vld [vmem:[%s914_s1 + $0xd0] sm:$0xff] }
   0x7   :  { %467 = vmatpush3.msra.mxu1 %v68_v9  ;;  %434 = vmatpush3.msra.mxu0 %v35_v8  ;;  %v66_v16 = vld [vmem:[%s914_s1 + $0x160] sm:$0xff]  ;;  %v81_v18 = vld [vmem:[%s914_s1 + $0x1d8] sm:$0xff]  ;;  %v32_v21 = vld [vmem:[%s914_s1 + $0x50] sm:$0xff] }
   0x8   :  { %468 = vmatprep.subr.mxu1 %v83_v10  ;;  %435 = vmatprep.subr.mxu0 %v50_v11  ;;  %v65_v20 = vld [vmem:[%s914_s1 + $0x158] sm:$0xff]  ;;  %v80_v22 = vld [vmem:[%s914_s1 + $0x1d0] sm:$0xff]  ;;  %v47_v23 = vld [vmem:[%s914_s1 + $0xc8] sm:$0xff] }
   0x9   :  { %469 = vmatpush3.msra.mxu1 %v67_v12  ;;  %436 = vmatpush3.msra.mxu0 %v34_v13  ;;  %v64_v24 = vld [vmem:[%s914_s1 + $0x150] sm:$0xff]  ;;  %v31_v25 = vld [vmem:[%s914_s1 + $0x48] sm:$0xff]  ;;  %v46_v27 = vld [vmem:[%s914_s1 + $0xc0] sm:$0xff] }
   0xa   :  { %470 = vmatprep.subr.mxu1 %v82_v14  ;;  %437 = vmatprep.subr.mxu0 %v49_v15  ;;  %v79_v26 = vld [vmem:[%s914_s1 + $0x1c8] sm:$0xff]  ;;  %v30_v29 = vld [vmem:[%s914_s1 + $0x40] sm:$0xff]  ;;  %v45_v31 = vld [vmem:[%s914_s1 + $0xb8] sm:$0xff] }
   0xb   :  { %471 = vmatpush3.msra.mxu1 %v66_v16  ;;  %438 = vmatpush3.msra.mxu0 %v33_v17  ;;  %v63_v28 = vld [vmem:[%s914_s1 + $0x148] sm:$0xff]  ;;  %v78_v30 = vld [vmem:[%s914_s1 + $0x1c0] sm:$0xff]  ;;  %v29_v33 = vld [vmem:[%s914_s1 + $0x38] sm:$0xff] }
   0xc   :  { %472 = vmatprep.subr.mxu1 %v81_v18  ;;  %439 = vmatprep.subr.mxu0 %v48_v19  ;;  %v62_v32 = vld [vmem:[%s914_s1 + $0x140] sm:$0xff]  ;;  %v77_v34 = vld [vmem:[%s914_s1 + $0x1b8] sm:$0xff]  ;;  %v44_v35 = vld [vmem:[%s914_s1 + $0xb0] sm:$0xff] }
   0xd   :  { %473 = vmatpush3.msra.mxu1 %v65_v20  ;;  %440 = vmatpush3.msra.mxu0 %v32_v21  ;;  %v61_v36 = vld [vmem:[%s914_s1 + $0x138] sm:$0xff]  ;;  %v28_v37 = vld [vmem:[%s914_s1 + $0x30] sm:$0xff]  ;;  %v43_v39 = vld [vmem:[%s914_s1 + $0xa8] sm:$0xff] }
   0xe   :  { %474 = vmatprep.subr.mxu1 %v80_v22  ;;  %441 = vmatprep.subr.mxu0 %v47_v23  ;;  %v76_v38 = vld [vmem:[%s914_s1 + $0x1b0] sm:$0xff]  ;;  %v27_v41 = vld [vmem:[%s914_s1 + $0x28] sm:$0xff]  ;;  %v42_v43 = vld [vmem:[%s914_s1 + $0xa0] sm:$0xff] }
   0xf   :  { %475 = vmatpush3.msra.mxu1 %v64_v24  ;;  %442 = vmatpush3.msra.mxu0 %v31_v25  ;;  %v60_v40 = vld [vmem:[%s914_s1 + $0x130] sm:$0xff]  ;;  %v75_v42 = vld [vmem:[%s914_s1 + $0x1a8] sm:$0xff]  ;;  %v26_v45 = vld [vmem:[%s914_s1 + $0x20] sm:$0xff] }
  0x10   :  { %476 = vmatprep.subr.mxu1 %v79_v26  ;;  %443 = vmatprep.subr.mxu0 %v46_v27  ;;  %v59_v44 = vld [vmem:[%s914_s1 + $0x128] sm:$0xff]  ;;  %v74_v46 = vld [vmem:[%s914_s1 + $0x1a0] sm:$0xff]  ;;  %v41_v47 = vld [vmem:[%s914_s1 + $0x98] sm:$0xff] }
  0x11   :  { %477 = vmatpush3.msra.mxu1 %v63_v28  ;;  %444 = vmatpush3.msra.mxu0 %v30_v29  ;;  %v58_v48 = vld [vmem:[%s914_s1 + $0x120] sm:$0xff]  ;;  %v25_v49 = vld [vmem:[%s914_s1 + $0x18] sm:$0xff]  ;;  %v40_v51 = vld [vmem:[%s914_s1 + $0x90] sm:$0xff] }
  0x12   :  { %478 = vmatprep.subr.mxu1 %v78_v30  ;;  %445 = vmatprep.subr.mxu0 %v45_v31  ;;  %v73_v50 = vld [vmem:[%s914_s1 + $0x198] sm:$0xff]  ;;  %v24_v53 = vld [vmem:[%s914_s1 + $0x10] sm:$0xff]  ;;  %v39_v55 = vld [vmem:[%s914_s1 + $0x88] sm:$0xff] }
  0x13   :  { %479 = vmatpush3.msra.mxu1 %v62_v32  ;;  %446 = vmatpush3.msra.mxu0 %v29_v33  ;;  %v57_v52 = vld [vmem:[%s914_s1 + $0x118] sm:$0xff]  ;;  %v72_v54 = vld [vmem:[%s914_s1 + $0x190] sm:$0xff]  ;;  %v23_v57 = vld [vmem:[%s914_s1 + $0x8] sm:$0xff] }
  0x14   :  { %480 = vmatprep.subr.mxu1 %v77_v34  ;;  %447 = vmatprep.subr.mxu0 %v44_v35  ;;  %v56_v56 = vld [vmem:[%s914_s1 + $0x110] sm:$0xff]  ;;  %v71_v58 = vld [vmem:[%s914_s1 + $0x188] sm:$0xff]  ;;  %v38_v59 = vld [vmem:[%s914_s1 + $0x80] sm:$0xff] }
  0x15   :  { %481 = vmatpush3.msra.mxu1 %v61_v36  ;;  %448 = vmatpush3.msra.mxu0 %v28_v37  ;;  %v16_v60 = vld [vmem:[%s913_s0 + $0x8] sm:$0xff]  ;;  %v22_v61 = vld [vmem:[%s914_s1] sm:$0xff]  ;;  %v117_v1 = vld [vmem:[%s914_s1 + $0x2f8] sm:$0xff] }
  0x16   :  { %482 = vmatprep.subr.mxu1 %v76_v38  ;;  %449 = vmatprep.subr.mxu0 %v43_v39  ;;  %v55_v62 = vld [vmem:[%s914_s1 + $0x108] sm:$0xff]  ;;  %v15_v63 = vld [vmem:[%s913_s0] sm:$0xff]  ;;  %v18_v3 = vld [vmem:[%s913_s0 + $0x18] sm:$0xff] }
  0x17   :  { %483 = vmatpush3.msra.mxu1 %v60_v40  ;;  %450 = vmatpush3.msra.mxu0 %v27_v41  ;;  %v70_v0 = vld [vmem:[%s914_s1 + $0x180] sm:$0xff]  ;;  %v101_v4 = vld [vmem:[%s914_s1 + $0x278] sm:$0xff]  ;;  %v17_v5 = vld [vmem:[%s913_s0 + $0x10] sm:$0xff] }
  0x18   :  { %484 = vmatprep.subr.mxu1 %v75_v42  ;;  %451 = vmatprep.subr.mxu0 %v42_v43  ;;  %v54_v2 = vld [vmem:[%s914_s1 + $0x100] sm:$0xff]  ;;  %v116_v6 = vld [vmem:[%s914_s1 + $0x2f0] sm:$0xff]  ;;  %v20_v8 = vld [vmem:[%s913_s0 + $0x28] sm:$0xff] }
  0x19   :  { %485 = vmatpush3.msra.mxu1 %v59_v44  ;;  %452 = vmatpush3.msra.mxu0 %v26_v45  ;;  %v100_v7 = vld [vmem:[%s914_s1 + $0x270] sm:$0xff]  ;;  %v115_v9 = vld [vmem:[%s914_s1 + $0x2e8] sm:$0xff] }
  0x1a   :  { %486 = vmatprep.subr.mxu1 %v74_v46  ;;  %453 = vmatprep.subr.mxu0 %v41_v47 }
  0x1b   :  { %487 = vmatpush3.msra.mxu1 %v58_v48  ;;  %454 = vmatpush3.msra.mxu0 %v25_v49 }
  0x1c   :  { %488 = vmatprep.subr.mxu1 %v73_v50  ;;  %455 = vmatprep.subr.mxu0 %v40_v51 }
  0x1d   :  { %489 = vmatpush3.msra.mxu1 %v57_v52  ;;  %456 = vmatpush3.msra.mxu0 %v24_v53 }
  0x1e   :  { %490 = vmatprep.subr.mxu1 %v72_v54  ;;  %457 = vmatprep.subr.mxu0 %v39_v55 }
  0x1f   :  { %491 = vmatpush3.msra.mxu1 %v56_v56  ;;  %458 = vmatpush3.msra.mxu0 %v23_v57 }
  0x20   :  { %492 = vmatprep.subr.mxu1 %v71_v58  ;;  %459 = vmatprep.subr.mxu0 %v38_v59 }
  0x21   :  { %195 = vmatprep.mubr.f32.mxu0 %v16_v60  ;;  %460 = vmatpush3.msra.mxu0 %v22_v61 }
  0x22   :  { %493 = vmatpush3.msra.mxu1 %v55_v62  ;;  %196 = vmatmul.mubr.f32.vlgmr.msra.gmra.mxu0 %v15_v63 }
  0x23   :  { %494 = vmatprep.subr.mxu1 %v70_v0  ;;  %499 = vmatprep.subr.mxu0 %v117_v1 }
  0x24   :  { %495 = vmatpush3.msra.mxu1 %v54_v2  ;;  %265 = vmatprep.mubr.f32.mxu1 %v18_v3 }
  0x25   :  { %500 = vmatpush3.msra.mxu0 %v101_v4 }
  0x26   :  { %8 = vsyncpa [#allocation3], 0  ;;  %266 = vmatmul.mubr.f32.vlgmr.msra.gmra.mxu1 %v17_v5  ;;  %501 = vmatprep.subr.mxu0 %v116_v6  ;;  %v99_v10 = vld [vmem:[%s914_s1 + $0x268] sm:$0xff]  ;;  %v114_v12 = vld [vmem:[%s914_s1 + $0x2e0] sm:$0xff]  ;;  %v569_v14 = vmov 0.0   ;;  %vm127_vm0 = vcmask 130048  }
  0x27   :  { %v119_v11 = vld [vmem:[%s914_s1 + $0x308] sm:$0xff]  ;;  %502 = vmatpush3.msra.mxu0 %v100_v7  ;;  %335 = vmatprep.mubr.f32.mxu0 %v20_v8  ;;  %v98_v13 = vld [vmem:[%s914_s1 + $0x260] sm:$0xff]  ;;  %v113_v16 = vld [vmem:[%s914_s1 + $0x2d8] sm:$0xff]  ;;  %vm570_vm1 = vmmov 0   ;;  %vm411_vm2 = vcmask 80896  }
  0x28   :  { %503 = vmatprep.subr.mxu0 %v115_v9  ;;  %537 = vmatprep.subr.mxu1 %v569_v14  ;;  %v118_v15 = vld [vmem:[%s914_s1 + $0x300] sm:$0xff]  ;;  %v97_v17 = vld [vmem:[%s914_s1 + $0x258] sm:$0xff]  ;;  %v21_v18 = vld [vmem:[%s913_s0 + $0x30] sm:$0xff] }
  0x29   :  { %504 = vmatpush3.msra.mxu0 %v99_v10  ;;  %538 = vmatpush3.msra.mxu1 %v119_v11  ;;  %v112_v19 = vld [vmem:[%s914_s1 + $0x2d0] sm:$0xff]  ;;  %v111_v21 = vld [vmem:[%s914_s1 + $0x2c8] sm:$0xff]  ;;  %v110_v23 = vld [vmem:[%s914_s1 + $0x2c0] sm:$0xff] }
  0x2a   :  { %505 = vmatprep.subr.mxu0 %v114_v12  ;;  %539 = vmatprep.subr.mxu1 %v569_v14  ;;  %v96_v20 = vld [vmem:[%s914_s1 + $0x250] sm:$0xff]  ;;  %v95_v22 = vld [vmem:[%s914_s1 + $0x248] sm:$0xff]  ;;  %v94_v24 = vld [vmem:[%s914_s1 + $0x240] sm:$0xff] }
  0x2b   :  { %506 = vmatpush3.msra.mxu0 %v98_v13  ;;  %540 = vmatpush3.msra.mxu1 %v118_v15  ;;  %v109_v25 = vld [vmem:[%s914_s1 + $0x2b8] sm:$0xff]  ;;  %v108_v27 = vld [vmem:[%s914_s1 + $0x2b0] sm:$0xff]  ;;  %v107_v29 = vld [vmem:[%s914_s1 + $0x2a8] sm:$0xff] }
  0x2c   :  { %507 = vmatprep.subr.mxu0 %v113_v16  ;;  %541 = vmatprep.mubr.msk.f32.mxu1 %vm570_vm1, %v569_v14  ;;  %v93_v26 = vld [vmem:[%s914_s1 + $0x238] sm:$0xff]  ;;  %v92_v28 = vld [vmem:[%s914_s1 + $0x230] sm:$0xff]  ;;  %v91_v30 = vld [vmem:[%s914_s1 + $0x228] sm:$0xff] }
  0x2d   :  { %508 = vmatpush3.msra.mxu0 %v97_v17  ;;  %542 = vmatmul.mubr.msk.f32.vlgmr.msra.gmra.mxu1 %vm127_vm0, %v21_v18  ;;  %v106_v31 = vld [vmem:[%s914_s1 + $0x2a0] sm:$0xff]  ;;  %v105_v33 = vld [vmem:[%s914_s1 + $0x298] sm:$0xff]  ;;  %v104_v35 = vld [vmem:[%s914_s1 + $0x290] sm:$0xff] }
  0x2e   :  { %509 = vmatprep.subr.mxu0 %v112_v19  ;;  %v90_v32 = vld [vmem:[%s914_s1 + $0x220] sm:$0xff]  ;;  %v89_v34 = vld [vmem:[%s914_s1 + $0x218] sm:$0xff]  ;;  %v88_v36 = vld [vmem:[%s914_s1 + $0x210] sm:$0xff] }
  0x2f   :  { %510 = vmatpush3.msra.mxu0 %v96_v20  ;;  %v103_v37 = vld [vmem:[%s914_s1 + $0x288] sm:$0xff]  ;;  %v102_v39 = vld [vmem:[%s914_s1 + $0x280] sm:$0xff] }
  0x30   :  { %511 = vmatprep.subr.mxu0 %v111_v21  ;;  %v87_v38 = vld [vmem:[%s914_s1 + $0x208] sm:$0xff]  ;;  %v86_v40 = vld [vmem:[%s914_s1 + $0x200] sm:$0xff] }
  0x31   :  { %512 = vmatpush3.msra.mxu0 %v95_v22  ;;  %v19_v41 = vld [vmem:[%s913_s0 + $0x20] sm:$0xff]  ;;  %s571_s0 = smov [#allocation2]  }
  0x32   :  { %513 = vmatprep.subr.mxu0 %v110_v23  ;;  %v427_v49 = vld [vmem:[%s915_s2] ss:$0 sm:$0xff]  ;;  %s419_s1 = sshll.u32 %s571_s0, 4  ;;  %s420_s1 = int_to_ptr.vmem [resolvable:$true] %s419_s1 }
  0x33   :  { %514 = vmatpush3.msra.mxu0 %v94_v24  ;;  %s547_s8 = scalar_lea.vmem %s420_s1, 128  ;;  %p552_p1 = scmp.lt.s32.totalorder %s420_s1, %s420_s1 }
  0x34   :  { %515 = vmatprep.subr.mxu0 %v109_v25  ;;  %p548_p0 = scmp.ne.s32.totalorder %s420_s1, %s547_s8  ;;  %p553_p2 = scmp.lt.s32.totalorder %s547_s8, %s547_s8 }
  0x35   :  { %516 = vmatpush3.msra.mxu0 %v93_v26 }
  0x36   :  { %517 = vmatprep.subr.mxu0 %v108_v27  ;;  %p554_p3 = por %p553_p2, %p552_p1 }
  0x37   :  { %518 = vmatpush3.msra.mxu0 %v92_v28 }
  0x38   :  { %519 = vmatprep.subr.mxu0 %v107_v29  ;;  %p555_p4 = pnand %p554_p3, %p548_p0 }
  0x39   :  { %520 = vmatpush3.msra.mxu0 %v91_v30 }
  0x3a   :  { %521 = vmatprep.subr.mxu0 %v106_v31 }
  0x3b   :  { %522 = vmatpush3.msra.mxu0 %v90_v32 }
  0x3c   :  { %523 = vmatprep.subr.mxu0 %v105_v33 }
  0x3d   :  { %524 = vmatpush3.msra.mxu0 %v89_v34 }
  0x3e   :  { %525 = vmatprep.subr.mxu0 %v104_v35 }
  0x3f   :  { %526 = vmatpush3.msra.mxu0 %v88_v36 }
  0x40   :  { %527 = vmatprep.subr.mxu0 %v103_v37 }
  0x41   :  { %528 = vmatpush3.msra.mxu0 %v87_v38 }
  0x42   :  { %529 = vmatprep.subr.mxu0 %v102_v39 }
  0x43   :  { %530 = vmatpush3.msra.mxu0 %v86_v40 }
  0x44   :  { %336 = vmatmul.mubr.f32.vlgmr.msra.gmra.mxu0 %v19_v41 }
  0xe2   :  { %v461_v46 = vpop.f32.mrf.mxu0 }
  0xe4   :  { %v462_v47 = vpop.f32.mrf.mxu0 }
  0xe5   :  { %v463_v48 = vadd.f32 %v462_v47, %v461_v46 }
  0xe6   :  { %v496_v42 = vpop.f32.mrf.mxu1 }
  0xe7   :  { %v198_v50 = vadd.f32 %v463_v48, %v427_v49 }
  0xe8   :  { %v497_v43 = vpop.f32.mrf.mxu1 }
  0xe9   :  { %v498_v51 = vadd.f32 %v497_v43, %v496_v42 }
  0xeb   :  { %v268_v54 = vadd.f32 %v498_v51, %v198_v50 }
  0xed   :  { %v407_v44 = vpop.f32.mrf.mxu1 }
  0xef   :  { %v543_v45 = vpop.f32.mrf.mxu1 }
 0x104   :  { %v531_v52 = vpop.f32.mrf.mxu0 }
 0x106   :  { %v532_v53 = vpop.f32.mrf.mxu0 }
 0x107   :  { %v533_v55 = vadd.f32 %v532_v53, %v531_v52 }
 0x109   :  { %v338_v56 = vadd.f32 %v533_v55, %v268_v54 }
 0x10b   :  { %v408_v57 = vadd.f32 %v407_v44, %v338_v56 }
 0x10d   :  { %412 = vst.msk [vmem:[#allocation2] sm:$0xff] %vm411_vm2, %v408_v57 }
 0x10e   :  { %558 = shalt.err (!%p555_p4)
}
 0x10f   :  { %422 = dma.vmem_to_hbm [thread:$0]  %s420_s1, 128, %s916_s3, [#allocation3]  }
 0x110   :  { %567 = dma.done.wait [#allocation3], 128  }
 0x111   :  { %568 = vsyncadd [#allocation3], 4294967168 }
 0x112   :  { %426 = vsyncpa [#allocation3], 1 }

</bundles_post_ra>
